<compile_context>
chip_gen: v7x
topology: tpu7x:2x2x1
jax: 0.10.0
libtpu: 0.0.40
codegen_flags: <defaults>
</compile_context>

<pallas_src>
import jax
import jax.numpy as jnp
from jax.experimental import pallas as pl
from jax.experimental.pallas import tpu as pltpu


# ---------------------------------------------------------------------------
# Kernels
# ---------------------------------------------------------------------------

def _make_se_single_pass_kernel(inv_hw):
    """Single pass pool + excite + scale.  x block is (TB, C, HW)."""
    inv = float(inv_hw)  # Python float -> inlined literal, not a captured const

    def kernel(x_ref, w1t_ref, w2t_ref, o_ref):
        # squeeze: f32 accumulation over the lane axis, divide folded into a
        # constant multiply.  x_ref is re-read in the scale step below instead
        # of binding a block-sized value across the matmuls.
        y = jnp.sum(x_ref[...], axis=-1, dtype=jnp.float32) * inv          # (TB, C)
        # excitation: Linear -> ReLU -> Linear -> Sigmoid (weights are
        # pre-transposed in the wrapper; they are tiny).
        h = jnp.maximum(
            jnp.dot(y, w1t_ref[...], preferred_element_type=jnp.float32,
                    precision=jax.lax.Precision.HIGHEST), 0.0)             # (TB, Cr)
        s = jax.nn.sigmoid(
            jnp.dot(h, w2t_ref[...], preferred_element_type=jnp.float32,
                    precision=jax.lax.Precision.HIGHEST))                  # (TB, C)
        # scale: cast the tiny gate once; streaming multiply stays x.dtype.
        o_ref[...] = x_ref[...] * s.astype(o_ref.dtype)[:, :, None]

    return kernel


def _make_pool_excite_kernel(hw_total, hw_tile, inv_hw):
    """Pass 1 of the tiled fallback: per-image channel gates (C, 1) in f32."""
    inv = float(inv_hw)
    hw_total = int(hw_total)
    hw_tile = int(hw_tile)

    def kernel(x_ref, w1_ref, w2_ref, g_ref):
        # x_ref: (C, hw_tile)  w1_ref: (Cr, C)  w2_ref: (C, Cr)  g_ref: (C, 1)
        t = pl.program_id(1)

        @pl.when(t == 0)
        def _():
            g_ref[...] = jnp.zeros_like(g_ref)

        # Mask the padded tail of the last HW tile before accumulating.
        col = jax.lax.broadcasted_iota(jnp.int32, x_ref.shape, 1) + t * hw_tile
        xm = jnp.where(col < hw_total, x_ref[...].astype(jnp.float32), 0.0)
        g_ref[...] += jnp.sum(xm, axis=-1, keepdims=True)

        @pl.when(t == pl.num_programs(1) - 1)
        def _():
            y = g_ref[...] * inv                                           # (C, 1)
            h = jnp.maximum(
                jnp.dot(w1_ref[...], y, preferred_element_type=jnp.float32,
                        precision=jax.lax.Precision.HIGHEST), 0.0)         # (Cr, 1)
            g_ref[...] = jax.nn.sigmoid(
                jnp.dot(w2_ref[...], h, preferred_element_type=jnp.float32,
                        precision=jax.lax.Precision.HIGHEST))              # (C, 1)

    return kernel


def _scale_kernel(x_ref, g_ref, o_ref):
    """Pass 2 of the tiled fallback: elementwise scale, tiled over HW."""
    o_ref[...] = x_ref[...] * g_ref[...].astype(o_ref.dtype)


# ---------------------------------------------------------------------------
# Wrapper
# ---------------------------------------------------------------------------

_HEADROOM_BYTES = 2 * 1024 * 1024   # Mosaic internal scratch + small temporaries


def _vmem_budget_bytes():
    """~80% of physical VMEM (≈51 MiB on v7x, ≈102 MiB on v5e/v6e)."""
    phys = 128 * 1024 * 1024
    try:
        info = pltpu.get_tpu_info()
        phys = int(getattr(info, "vmem_capacity_bytes", phys))
    except Exception:
        pass
    return max(int(phys * 0.80), 48 * 1024 * 1024)


def se_layer(x, w1, w2, *, force_tiled=False, _max_hw_tile=None):
    """SELayer forward.

    x:  (B, C, H, W) NCHW (kept NCHW end-to-end; the (B, C, HW) view is free).
    w1: (C//r, C), w2: (C, C//r) exactly as nn.Linear(...).weight (no bias).
    """
    b, c, h, w = x.shape
    hw = h * w
    cr = w1.shape[0]
    assert w1.shape == (cr, c) and w2.shape == (c, cr)

    budget = _vmem_budget_bytes()
    itemsize = x.dtype.itemsize
    img_bytes = c * hw * itemsize
    weight_bytes = 2 * c * cr * w1.dtype.itemsize
    fixed = 4 * weight_bytes + _HEADROOM_BYTES      # double-buffered weights + slack

    x3 = x.reshape(b, c, hw)                        # free reshape: stays NCHW

    single_pass_ok = (not force_tiled) and (4 * img_bytes + fixed <= budget)

    if single_pass_ok:
        # ---- single pass: whole image(s) per grid step ----------------------
        # TB images per step (amortizes per-step overhead, M = TB matvec) while
        # keeping >= 2 parallel steps when B >= 2 for v7x's two TensorCores.
        tb = 1
        for cand in range(1, max(1, b // 2) + 1):
            if b % cand == 0 and 4 * cand * img_bytes + fixed <= budget:
                tb = cand
        needed = 4 * tb * img_bytes + fixed
        vmem_limit = int(min(max(needed, 32 * 1024 * 1024), budget))

        out = pl.pallas_call(
            _make_se_single_pass_kernel(1.0 / hw),
            out_shape=jax.ShapeDtypeStruct((b, c, hw), x.dtype),
            grid_spec=pltpu.PrefetchScalarGridSpec(
                num_scalar_prefetch=0,
                grid=(b // tb,),
                in_specs=[
                    pl.BlockSpec((tb, c, hw), lambda i: (i, 0, 0)),
                    pl.BlockSpec((c, cr), lambda i: (0, 0)),   # w1.T
                    pl.BlockSpec((cr, c), lambda i: (0, 0)),   # w2.T
                ],
                out_specs=pl.BlockSpec((tb, c, hw), lambda i: (i, 0, 0)),
            ),
            compiler_params=pltpu.CompilerParams(
                dimension_semantics=("parallel",),
                vmem_limit_bytes=vmem_limit,
            ),
        )(x3, jnp.transpose(w1), jnp.transpose(w2))
        return out.reshape(b, c, h, w)

    # ---- 2-pass fallback: pool-then-scale, tiled over HW ---------------------
    # Lane-dense HW tiles (multiples of 128); partial last tile is masked in
    # the pooling pass and its out-of-bounds output columns are dropped.
    max_tile_by_budget = (budget - fixed) // max(1, 4 * c * itemsize)
    hw_tile = max(128, (max_tile_by_budget // 128) * 128)
    hw_tile = min(hw_tile, pl.cdiv(hw, 128) * 128)
    if _max_hw_tile is not None:
        hw_tile = min(hw_tile, int(_max_hw_tile))
    hw_tile = max(128, int(hw_tile))
    n_hw = pl.cdiv(hw, hw_tile)

    pool_vmem = int(min(max(2 * c * hw_tile * itemsize + fixed,
                            32 * 1024 * 1024), budget))
    scale_vmem = int(min(max(4 * c * hw_tile * itemsize + fixed,
                             32 * 1024 * 1024), budget))

    # Pass 1: per-image channel gates (B, C, 1) in f32.
    gates = pl.pallas_call(
        _make_pool_excite_kernel(hw, hw_tile, 1.0 / hw),
        out_shape=jax.ShapeDtypeStruct((b, c, 1), jnp.float32),
        grid_spec=pltpu.PrefetchScalarGridSpec(
            num_scalar_prefetch=0,
            grid=(b, n_hw),
            in_specs=[
                pl.BlockSpec((None, c, hw_tile), lambda i, t: (i, 0, t)),
                pl.BlockSpec((cr, c), lambda i, t: (0, 0)),
                pl.BlockSpec((c, cr), lambda i, t: (0, 0)),
            ],
            out_specs=pl.BlockSpec((None, c, 1), lambda i, t: (i, 0, 0)),
        ),
        compiler_params=pltpu.CompilerParams(
            dimension_semantics=("parallel", "arbitrary"),
            vmem_limit_bytes=pool_vmem,
        ),
    )(x3, w1, w2)

    # Pass 2: elementwise scale.  Both axes parallel -> the HW tiles give
    # v7x's two TensorCores work even at B == 1.
    # TODO(synk): add pipeline_mode=pl.Buffered(3) on the x input if DMA is
    #   exposed on very long HW streams.
    out = pl.pallas_call(
        _scale_kernel,
        out_shape=jax.ShapeDtypeStruct((b, c, hw), x.dtype),
        grid_spec=pltpu.PrefetchScalarGridSpec(
            num_scalar_prefetch=0,
            grid=(b, n_hw),
            in_specs=[
                pl.BlockSpec((None, c, hw_tile), lambda i, t: (i, 0, t)),
                pl.BlockSpec((None, c, 1), lambda i, t: (i, 0, 0)),
            ],
            out_specs=pl.BlockSpec((None, c, hw_tile), lambda i, t: (i, 0, t)),
        ),
        compiler_params=pltpu.CompilerParams(
            dimension_semantics=("parallel", "parallel"),
            vmem_limit_bytes=scale_vmem,
        ),
    )(x3, gates)
    return out.reshape(b, c, h, w)


# ---------------------------------------------------------------------------
# Pure-JAX reference (mirrors the PyTorch module; HIGHEST-precision dots so
# the fp32 comparison is apples-to-apples on the MXU).
# ---------------------------------------------------------------------------

def se_layer_ref(x, w1, w2):
    y = jnp.mean(x, axis=(2, 3))                                         # (B, C)
    y = jnp.maximum(
        jnp.dot(y, w1.T, precision=jax.lax.Precision.HIGHEST), 0.0)      # (B, Cr)
    y = jax.nn.sigmoid(
        jnp.dot(y, w2.T, precision=jax.lax.Precision.HIGHEST))           # (B, C)
    return x * y[:, :, None, None]


if __name__ == "__main__":
    key = jax.random.PRNGKey(0)

    # 1) Primary demo shapes implied by the module (single-pass, TB = 1).
    B, C, H, W = 2, 4, 16, 16
    reduction = 4
    Cr = C // reduction
    kx, k1, k2 = jax.random.split(key, 3)
    x = jax.random.normal(kx, (B, C, H, W), dtype=jnp.float32)
    w1 = jax.random.normal(k1, (Cr, C), dtype=jnp.float32) * 0.5   # fc[0].weight
    w2 = jax.random.normal(k2, (C, Cr), dtype=jnp.float32) * 0.5   # fc[2].weight

    out = jax.block_until_ready(se_layer(x, w1, w2))
    ref = se_layer_ref(x, w1, w2)
    assert out.shape == (B, C, H, W)
    assert jnp.allclose(out, ref, atol=2e-5, rtol=1e-4), "mismatch (single-pass)"

    # 2) Single-pass with TB-batching exercised (B=4 -> TB=2, 2 grid steps).
    B1 = 4
    k6, k7, k8 = jax.random.split(jax.random.PRNGKey(2), 3)
    x1 = jax.random.normal(k6, (B1, C, H, W), dtype=jnp.float32)
    w1a = jax.random.normal(k7, (Cr, C), dtype=jnp.float32) * 0.5
    w2a = jax.random.normal(k8, (C, Cr), dtype=jnp.float32) * 0.5
    out1 = jax.block_until_ready(se_layer(x1, w1a, w2a))
    ref1 = se_layer_ref(x1, w1a, w2a)
    assert out1.shape == (B1, C, H, W)
    assert jnp.allclose(out1, ref1, atol=2e-5, rtol=1e-4), "mismatch (TB-batched)"

    # 3) Forced 2-pass HW-tiled fallback (used when a whole image exceeds the
    #    per-generation VMEM budget), including a masked partial last HW tile
    #    (HW = 144 with a 128-wide tile).
    B2, C2, H2, W2, r2 = 2, 8, 12, 12, 4
    k3, k4, k5 = jax.random.split(jax.random.PRNGKey(1), 3)
    x2 = jax.random.normal(k3, (B2, C2, H2, W2), dtype=jnp.float32)
    w1b = jax.random.normal(k4, (C2 // r2, C2), dtype=jnp.float32) * 0.3
    w2b = jax.random.normal(k5, (C2, C2 // r2), dtype=jnp.float32) * 0.3
    out2 = jax.block_until_ready(
        se_layer(x2, w1b, w2b, force_tiled=True, _max_hw_tile=128))
    ref2 = se_layer_ref(x2, w1b, w2b)
    assert out2.shape == (B2, C2, H2, W2)
    assert jnp.allclose(out2, ref2, atol=2e-5, rtol=1e-4), "mismatch (tiled)"

    print("KERNEL_OK")
</pallas_src>

<mosaic_0001>
module attributes {stable_mosaic.version = 11 : i64} {
  func.func @kernel(%arg0: i32, %arg1: memref<1x4x256xf32, #tpu.memory_space<vmem>>, %arg2: memref<4x1xf32, #tpu.memory_space<vmem>>, %arg3: memref<1x4xf32, #tpu.memory_space<vmem>>, %arg4: memref<1x4x256xf32, #tpu.memory_space<vmem>>) attributes {dimension_semantics = [#tpu.dimension_semantics<parallel>], iteration_bounds = array<i64: 2>, scalar_prefetch = 0 : i64, scratch_operands = 0 : i64, tpu.core_type = #tpu.core_type<tc>, window_params = [{transform_indices = @transform_0, window_bounds = array<i64: 1, 4, 256>}, {pipeline_mode = #tpu.pipeline_mode<synchronous>, transform_indices = @transform_1, window_bounds = array<i64: 4, 1>}, {pipeline_mode = #tpu.pipeline_mode<synchronous>, transform_indices = @transform_2, window_bounds = array<i64: 1, 4>}, {transform_indices = @transform_3, window_bounds = array<i64: 1, 4, 256>}]} {
    %c0 = arith.constant 0 : index
    %c0_0 = arith.constant 0 : index
    %c0_1 = arith.constant 0 : index
    %0 = vector.load %arg1[%c0, %c0_0, %c0_1] : memref<1x4x256xf32, #tpu.memory_space<vmem>>, vector<1x4x256xf32>
    %cst = arith.constant dense<0.000000e+00> : vector<1x4xf32>
    %1 = vector.multi_reduction <add>, %0, %cst [2] : vector<1x4x256xf32> to vector<1x4xf32>
    %cst_2 = arith.constant 3.906250e-03 : f32
    %2 = vector.broadcast %cst_2 : f32 to vector<1x4xf32>
    %3 = arith.mulf %1, %2 : vector<1x4xf32>
    %c0_3 = arith.constant 0 : index
    %c0_4 = arith.constant 0 : index
    %4 = vector.load %arg2[%c0_3, %c0_4] : memref<4x1xf32, #tpu.memory_space<vmem>>, vector<4x1xf32>
    %cst_5 = arith.constant dense<0.000000e+00> : vector<1x1xf32>
    %5 = tpu.matmul %3, %4, %cst_5 {dimension_numbers = #tpu.dot_dimension_numbers<[1], [0], [0], [1], [0, 0, 1, 1], [], []>, precision = #tpu.contract_precision<fp32>} : vector<1x4xf32>, vector<4x1xf32>, vector<1x1xf32> -> vector<1x1xf32>
    %cst_6 = arith.constant 0.000000e+00 : f32
    %6 = vector.broadcast %cst_6 : f32 to vector<1x1xf32>
    %7 = arith.maximumf %5, %6 : vector<1x1xf32>
    %c0_7 = arith.constant 0 : index
    %c0_8 = arith.constant 0 : index
    %8 = vector.load %arg3[%c0_7, %c0_8] : memref<1x4xf32, #tpu.memory_space<vmem>>, vector<1x4xf32>
    %cst_9 = arith.constant dense<0.000000e+00> : vector<1x4xf32>
    %9 = tpu.matmul %7, %8, %cst_9 {dimension_numbers = #tpu.dot_dimension_numbers<[1], [0], [0], [1], [0, 0, 1, 1], [], []>, precision = #tpu.contract_precision<fp32>} : vector<1x1xf32>, vector<1x4xf32>, vector<1x4xf32> -> vector<1x4xf32>
    %10 = arith.negf %9 : vector<1x4xf32>
    %11 = math.exp %10 : vector<1x4xf32>
    %cst_10 = arith.constant 1.000000e+00 : f32
    %12 = vector.broadcast %cst_10 : f32 to vector<1x4xf32>
    %13 = arith.addf %12, %11 : vector<1x4xf32>
    %14 = arith.divf %12, %13 : vector<1x4xf32>
    %c0_11 = arith.constant 0 : index
    %c0_12 = arith.constant 0 : index
    %c0_13 = arith.constant 0 : index
    %15 = vector.load %arg1[%c0_11, %c0_12, %c0_13] : memref<1x4x256xf32, #tpu.memory_space<vmem>>, vector<1x4x256xf32>
    %16 = vector.shape_cast %14 : vector<1x4xf32> to vector<1x4x1xf32>
    %17 = vector.broadcast %16 : vector<1x4x1xf32> to vector<1x4x256xf32>
    %18 = arith.mulf %15, %17 : vector<1x4x256xf32>
    %c0_14 = arith.constant 0 : index
    %c0_15 = arith.constant 0 : index
    %c0_16 = arith.constant 0 : index
    %19 = vector.load %arg4[%c0_14, %c0_15, %c0_16] : memref<1x4x256xf32, #tpu.memory_space<vmem>>, vector<1x4x256xf32>
    tpu.vector_store %arg4[%c0_14, %c0_15, %c0_16], %18 {strides = array<i32>} : memref<1x4x256xf32, #tpu.memory_space<vmem>>, vector<1x4x256xf32>,
    return
  }
  func.func @transform_0(%arg0: i32) -> (i32, i32, i32) {
    %c0_i32 = arith.constant 0 : i32
    %c0_i32_0 = arith.constant 0 : i32
    %c0_i32_1 = arith.constant 0 : i32
    return %arg0, %c0_i32, %c0_i32_0 : i32, i32, i32
  }
  func.func @transform_1(%arg0: i32) -> (i32, i32) {
    %c0_i32 = arith.constant 0 : i32
    %c0_i32_0 = arith.constant 0 : i32
    %c0_i32_1 = arith.constant 0 : i32
    return %c0_i32, %c0_i32_0 : i32, i32
  }
  func.func @transform_2(%arg0: i32) -> (i32, i32) {
    %c0_i32 = arith.constant 0 : i32
    %c0_i32_0 = arith.constant 0 : i32
    %c0_i32_1 = arith.constant 0 : i32
    return %c0_i32, %c0_i32_0 : i32, i32
  }
  func.func @transform_3(%arg0: i32) -> (i32, i32, i32) {
    %c0_i32 = arith.constant 0 : i32
    %c0_i32_0 = arith.constant 0 : i32
    %c0_i32_1 = arith.constant 0 : i32
    return %arg0, %c0_i32, %c0_i32_0 : i32, i32, i32
  }
}

</mosaic_0001>

<bundles_post_ra>
// kernel: tpu_custom_call.1
= control target key start
LH: loop header
LB: loop body
LE: loop exit
PB: predicated region body
PF: predicated region fallthrough
CT: control target
= control target key end

     0   :  { %8 = vsyncpa [#allocation3], 0  ;;  %s1739_s0 = inlined_call_operand.hbm [shape: f32[2,4,256], index: 0, kind: input, shape index: {}]   ;;  %s1740_s1 = inlined_call_operand.vmem [shape: f32[4,1], index: 1, kind: input, shape index: {}]   ;;  %s1741_s2 = inlined_call_operand.vmem [shape: f32[1,4], index: 2, kind: input, shape index: {}]   ;;  %s1742_s3 = inlined_call_operand.hbm [shape: f32[2,4,256], index: 3, kind: output, shape index: {}]  }
   0x1   :  { %10 = vsyncpa [#allocation3 + $0x1], 0 }
   0x2   :  { %11 = vsyncpa [#allocation4], 0 }
   0x3   :  { %13 = vsyncpa [#allocation4 + $0x1], 0  ;;  %s1521_s12 = smov 0   ;;  %s1523_s13 = smov 0  }
   0x4   :  { %s1525_s14 = smov 0   ;;  %s1527_s15 = smov 0  }
   0x5 LB: > { %s1542_s16 = sadd.s32 4294967295, %s1494_s15   ;;  %s1223_s17 = sadd.s32 4294967294, %s1494_s15   ;;  %s1494_s15 = sphi %s1527_s15, %s1757_s15   ;;  %s1490_s14 = sphi %s1525_s14, %s1756_s14   ;;  %s1486_s13 = sphi %s1523_s13, %s1755_s13   ;;  %s1482_s12 = sphi %s1521_s12, %s1754_s12  }
   0x6   : > { %s1546_s18 = sadd.s32 1, %s1494_s15   ;;  %s26_s19 = sadd.s32 1, %s1490_s14 }
   0x7   : > { %s23_s20 = ssub.s32 %s1494_s15, %s1546_s18  ;;  %p33_p0 = scmp.ne.s32.totalorder %s1490_s14, %s1486_s13 }
   0x8   : > { %p24_p1 = scmp.eq.s32.totalorder %s23_s20, 0  ;;  %p34_p2 = scmp.eq.s32.totalorder %s1494_s15, 0 }
   0x9   : > { %p39_p3 = scmp.ne.s32.totalorder %s1486_s13, %s1482_s12  ;;  %p40_p4 = scmp.eq.s32.totalorder %s1542_s16, 0 }
   0xa   : > { %s1558_s21 = scalar_select %p24_p1, %s1490_s14, %s26_s19  }
   0xb   : > { %p1560_p5 = por %p34_p2, %p33_p0  ;;  %p1564_p6 = por %p40_p4, %p39_p3 }
   0xc   : > { %p105_p7 = scmp.eq.s32.totalorder %s1542_s16, 1  ;;  %p111_p8 = scmp.eq.s32.totalorder %s1223_s17, 1 }
   0xd   : > { %p1356_p10 = scmp.lt.s32.totalorder %s1494_s15, 2  ;;  %s137_s26 = sand.u32 1, %s1490_s14  }
   0xe   : > { %p1571_p11 = por %p105_p7, %p33_p0  ;;  %p1575_p12 = por %p111_p8, %p39_p3 }
   0xf   : > { %s1238_s27 = sshll.u32 %s1494_s15, 7  ;;  %s1226_s28 = sshll.u32 %s137_s26, 3 }
  0x10   : > { %s1746_s24 = scalar_select %p1571_p11, 1, 0 }
  0x11   : > { %s1747_s25 = scalar_select %p1575_p12, 1, 0 }
  0x12   : > { %s1584_s4 = scalar_lea.hbm %s1739_s0, %s1238_s27  ;;  %s141_s5 = scalar_lea.vmem [#allocation2], %s1226_s28 }
  0x13   : > { %s149_s6 = sshll.u32 %s141_s5, 4  ;;  %p1588_p13 = pnand %p1356_p10, %p1560_p5  ;;  %s1592_s6 = int_to_ptr.vmem [resolvable:$true] %s149_s6 }
  0x14   : > { %s138_s8 = scalar_lea.sflag [#allocation3], %s137_s26  ;;  %s1398_s9 = scalar_lea.hbm %s1584_s4, 128 }
  0x15   : > { %p1399_p2 = scmp.ne.s32.totalorder %s1584_s4, %s1398_s9  ;;  %p1400_p3 = pneg %p1588_p13 }
  0x16   : > { %s1403_s17 = scalar_lea.hbm %s1739_s0, 256  ;;  %p1404_p5 = scmp.lt.u32.totalorder %s1584_s4, %s1739_s0 }
  0x17   : > { %p1401_p4 = pnand %p1400_p3, %p1399_p2  ;;  %p1405_p8 = scmp.lt.u32.totalorder %s1403_s17, %s1398_s9 }
  0x18   : > { %p1407_p9 = scmp.lt.u32.totalorder %s1398_s9, %s1584_s4 }
  0x19   : > { %p1402_p7 = pneg %p1401_p4  ;;  %p1406_p10 = por %p1405_p8, %p1404_p5 }
  0x1b   : > { %p1408_p0 = por %p1407_p9, %p1406_p10 }
  0x1d   : > { %p1409_p1 = pnand %p1408_p0, %p1402_p7 }
  0x1f   : > { %1412 = shalt.err (!%p1409_p1)
}
  0x20   : > { %s1413_s22 = scalar_lea.vmem %s1592_s6, 128  ;;  %s1496_s26 = smov [#allocation2]  }
  0x21   : > { %p1414_p2 = scmp.ne.s32.totalorder %s1592_s6, %s1413_s22  ;;  %s1418_s27 = sshll.u32 %s1496_s26, 4  ;;  %s1419_s27 = int_to_ptr.vmem [resolvable:$false] %s1418_s27 }
  0x22   : > { %s1420_s28 = scalar_lea.vmem %s1419_s27, 256  ;;  %p1421_p11 = scmp.lt.s32.totalorder %s1592_s6, %s1419_s27 }
  0x23   : > { %p1416_p4 = pnand %p1414_p2, %p1400_p3  ;;  %p1422_p5 = scmp.lt.s32.totalorder %s1420_s28, %s1413_s22 }
  0x25   : > { %p1417_p12 = pneg %p1416_p4  ;;  %p1423_p8 = por %p1422_p5, %p1421_p11 }
  0x27   : > { %p1424_p9 = pnand %p1423_p8, %p1417_p12 }
  0x29   : > { %1427 = shalt.err (!%p1424_p9)
}
  0x2a   : > { %1351 = dma.hbm_to_vmem [thread:$0]  (!%p1588_p13), %s1584_s4, 128, %s1592_s6, %s138_s8  }
  0x2b   : > { %p1749_p0 = scmp.lt.s32.totalorder %s1494_s15, 3  ;;  %p1750_p1 = scmp.ge.s32.totalorder %s1494_s15, 1 }
  0x2d   : > { %p155_p3 = pnand %p1750_p1, %p1749_p0 }
  0x2e   : > { %s1626_s29 = sand.u32 (!%p155_p3), 1, %s1486_s13  }
  0x2f   : > { %158 = sbr.rel (%p155_p3) target bundleno = 896 (0x380), region = 32  ;;  %s1230_s30 = sshll.u32 (!%p155_p3), %s1626_s29, 3 }
  0x30   : > { %s161_s5 = scalar_lea.sflag (!%p155_p3), [#allocation3], %s1626_s29  ;;  %s164_s7 = scalar_lea.vmem (!%p155_p3), [#allocation2], %s1230_s30 }
  0x36   : > { %1473 = dma.done.wait (%p1564_p6), %s161_s5, 128  }
  0x37   : > { %1475 = vsyncadd (%p1564_p6), %s161_s5, 4294967168  ;;  %vm191_vm0 = vcmask 1043456   ;;  %v1636_v0 = vld [vmem:[%s164_s7] sm:$0xff]  ;;  %v1497_v8 = vmov 0.0   ;;  %vm1498_vm1 = vmmov 0   ;;  %v200_v9 = vlaneseq  ;;  %s1239_s9 = sshll.u32 %s1542_s16, 7 }
  0x38   : > { %v189_v1 = vcombine.high %v1636_v0, %v1636_v0  ;;  %v192_v2 = vsel %vm191_vm0, %v1636_v0, 0.0  ;;  %v198_v5 = vld [vmem:[%s1740_s1] sm:$0xf]  ;;  %1264 = vmatprep.subr.mxu0 %v1497_v8  ;;  %1266 = vmatprep.mubr.msk.f32.mxu0 %vm1498_vm1, %v1497_v8  ;;  %vm206_vm2 = vcmask 31744   ;;  %vm664_vm3 = vcmask 1040384   ;;  %s186_s10 = scalar_lea.vmem [#allocation5], %s1230_s30  ;;  %s1695_s20 = scalar_lea.hbm %s1742_s3, %s1239_s9 }
  0x39   : > { %v210_v6 = vsel %vm191_vm0, %v198_v5, 0  ;;  %1294 = vmatprep.subr.mxu1 %v1497_v8  ;;  %1296 = vmatprep.mubr.msk.f32.mxu1 %vm1498_vm1, %v1497_v8  ;;  %v201_v10 = vand.u32 127, %v200_v9  ;;  %v1651_v11 = vshrl.u32 %v200_v9, 7  ;;  %v659_v26 = vld [vmem:[%s1741_s2] sm:$0x1]  ;;  %vm660_vm4 = vcmask 7168  }
  0x3a   : > { %v193_v3 = vsel %vm191_vm0, %v189_v1, 0.0  ;;  %v213_v7 = vand.u32 4294901760, %v210_v6  ;;  %v666_v27 = vsel %vm664_vm3, %v659_v26, 0  ;;  %v1499_v50 = vmov 839922192   ;;  %s1153_s11 = sshll.u32 %s186_s10, 4  ;;  %s1697_s11 = int_to_ptr.vmem [resolvable:$true] %s1153_s11 }
  0x3b   : > { %v194_v4 = vadd.f32 %v193_v3, %v192_v2  ;;  %v204_v12 = vsub.s32 %v201_v10, %v1651_v11  ;;  %v669_v28 = vand.u32 4294901760, %v666_v27  ;;  %v1122_v47 = vsub.s32 0, %v1651_v11  ;;  %s1139_s22 = scalar_lea.sflag [#allocation4], %s1626_s29  ;;  %s1428_s26 = scalar_lea.vmem %s1697_s11, 128 }
  0x3c   : > { %1265 = vmatpush3.msra.mxu0 %v213_v7  ;;  %v290_v14 = vsub.f32 %v210_v6, %v213_v7  ;;  %v1129_v51 = vunpack.c.l.s4 %v1499_v50  ;;  %p1429_p6 = scmp.ne.s32.totalorder %s1697_s11, %s1428_s26  ;;  %p1751_p11 = scmp.ne.s32.totalorder %s1746_s24, 0 }
  0x3d   : > { %195 = vadd.xlane.f32.xlu0 %v194_v4  ;;  %1269 = vmatprep.subr.mxu0 %v1497_v8  ;;  %v746_v29 = vsub.f32 %v666_v27, %v669_v28  ;;  %s1500_s16 = smov [#allocation5]  }
  0x3e   : > { %v291_v18 = vand.u32 4294901760, %v290_v14  ;;  %1295 = vmatpush3.msra.mxu1 %v669_v28  ;;  %v1130_v52 = vunpack.c.0.s8 %v1129_v51  ;;  %p1430_p12 = pnand %p1429_p6, %p1751_p11  ;;  %s1432_s27 = sshll.u32 %s1500_s16, 4  ;;  %s1433_s27 = int_to_ptr.vmem [resolvable:$false] %s1432_s27 }
  0x3f   : > { %1299 = vmatprep.subr.mxu1 %v1497_v8  ;;  %v747_v34 = vand.u32 4294901760, %v746_v29  ;;  %s1434_s28 = scalar_lea.vmem %s1433_s27, 256  ;;  %p1435_p7 = scmp.lt.s32.totalorder %s1697_s11, %s1433_s27 }
  0x40   : > { %v292_v21 = vsub.f32 %v290_v14, %v291_v18  ;;  %v1133_v53 = vsub.s32 %v1130_v52, %v1651_v11  ;;  %p1431_p13 = pneg %p1430_p12  ;;  %p1436_p10 = scmp.lt.s32.totalorder %s1434_s28, %s1428_s26 }
  0x41   : > { %v748_v37 = vsub.f32 %v746_v29, %v747_v34 }
  0x42   : > { %v293_v24 = vand.u32 4294901760, %v292_v21  ;;  %p1437_p2 = por %p1436_p10, %p1435_p7 }
  0x43   : > { %v749_v40 = vand.u32 4294901760, %v748_v37 }
  0x44   : > { %p1438_p4 = pnand %p1437_p2, %p1431_p13 }
  0xca   : > { %v196_v13 = vpop.xlane.xlu0 %195 }
  0xcb   : > { %v197_v15 = vmul.f32 0.00390625, %v196_v13 }
  0xcd   : > { %v205_v16 = vrot.slane %v197_v15, %v204_v12 }
  0xcf   : > { %v207_v17 = vsel %vm206_vm2, %v205_v16, 0 }
  0xd0   : > { %v278_v19 = vand.u32 4294901760, %v207_v17 }
  0xd2   : > { %v279_v20 = vsub.f32 %v207_v17, %v278_v19 }
  0xd4   : > { %v280_v22 = vand.u32 4294901760, %v279_v20 }
  0xd6   : > { %v281_v23 = vsub.f32 %v279_v20, %v280_v22 }
  0xd8   : > { %v282_v25 = vand.u32 4294901760, %v281_v23 }
  0xda   : > { %1267 = vmatmul.mubr.f32.vlgmr.msra.gmra.mrb[0].mxu0 %v282_v25 }
  0xdb   : > { %1270 = vmatpush3.msra.mxu0 %v293_v24  ;;  %1271 = vmatprep.mubr.msk.f32.mxu0 %vm1498_vm1, %v1497_v8 }
  0xdc   : > { %1274 = vmatprep.subr.mxu0 %v1497_v8 }
  0xe2   : > { %1272 = vmatmul.mubr.f32.vlgmr.msra.gmra.mrb[0].mxu0 %v278_v19 }
  0xe3   : > { %1275 = vmatpush3.msra.mxu0 %v290_v14  ;;  %1276 = vmatprep.mubr.msk.f32.mxu0 %vm1498_vm1, %v1497_v8 }
  0xe4   : > { %1279 = vmatprep.subr.mxu0 %v1497_v8 }
  0xea   : > { %1277 = vmatmul.mubr.f32.vlgmr.msra.gmra.mrb[0].mxu0 %v279_v20 }
  0xeb   : > { %1280 = vmatpush3.msra.mxu0 %v213_v7  ;;  %1281 = vmatprep.mubr.msk.f32.mxu0 %vm1498_vm1, %v1497_v8 }
  0xec   : > { %1284 = vmatprep.subr.mxu0 %v1497_v8 }
  0xf2   : > { %1282 = vmatmul.mubr.f32.vlgmr.msra.gmra.mrb[0].mxu0 %v280_v22 }
  0xf3   : > { %1285 = vmatpush3.msra.mxu0 %v291_v18  ;;  %1286 = vmatprep.mubr.msk.f32.mxu0 %vm1498_vm1, %v1497_v8 }
  0xf4   : > { %1289 = vmatprep.subr.mxu0 %v1497_v8 }
  0xfa   : > { %1287 = vmatmul.mubr.f32.vlgmr.msra.gmra.mrb[0].mxu0 %v278_v19 }
  0xfb   : > { %1290 = vmatpush3.msra.mxu0 %v213_v7  ;;  %1291 = vmatprep.mubr.msk.f32.mxu0 %vm1498_vm1, %v1497_v8 }
 0x102   : > { %1292 = vmatmul.mubr.f32.vlgmr.msra.gmra.mrb[0].mxu0 %v278_v19 }
 0x1d5   : > { %v654_v30 = vpop.f32.mrb[0].mxu0 }
 0x1d6   : > { %v658_v31 = vmax.f32 %v654_v30, 0.0  ;;  %v1293_v32 = vpop.f32.mrb[1].mxu0 }
 0x1d8   : > { %v662_v33 = vsel %vm660_vm4, %v658_v31, 0 }
 0x1d9   : > { %v734_v35 = vand.u32 4294901760, %v662_v33 }
 0x1db   : > { %v735_v36 = vsub.f32 %v662_v33, %v734_v35 }
 0x1dd   : > { %v736_v38 = vand.u32 4294901760, %v735_v36 }
 0x1df   : > { %v737_v39 = vsub.f32 %v735_v36, %v736_v38 }
 0x1e1   : > { %v738_v41 = vand.u32 4294901760, %v737_v39 }
 0x1e3   : > { %1297 = vmatmul.mubr.f32.vlgmr.msra.gmra.mrb[0].mxu1 %v738_v41 }
 0x1e4   : > { %1300 = vmatpush3.msra.mxu1 %v749_v40  ;;  %1301 = vmatprep.mubr.msk.f32.mxu1 %vm1498_vm1, %v1497_v8 }
 0x1e5   : > { %1304 = vmatprep.subr.mxu1 %v1497_v8 }
 0x1eb   : > { %1302 = vmatmul.mubr.f32.vlgmr.msra.gmra.mrb[0].mxu1 %v734_v35 }
 0x1ec   : > { %1305 = vmatpush3.msra.mxu1 %v746_v29  ;;  %1306 = vmatprep.mubr.msk.f32.mxu1 %vm1498_vm1, %v1497_v8 }
 0x1ed   : > { %1309 = vmatprep.subr.mxu1 %v1497_v8 }
 0x1f3   : > { %1307 = vmatmul.mubr.f32.vlgmr.msra.gmra.mrb[0].mxu1 %v735_v36 }
 0x1f4   : > { %1310 = vmatpush3.msra.mxu1 %v669_v28  ;;  %1311 = vmatprep.mubr.msk.f32.mxu1 %vm1498_vm1, %v1497_v8 }
 0x1f5   : > { %1314 = vmatprep.subr.mxu1 %v1497_v8 }
 0x1fb   : > { %1312 = vmatmul.mubr.f32.vlgmr.msra.gmra.mrb[0].mxu1 %v736_v38 }
 0x1fc   : > { %1315 = vmatpush3.msra.mxu1 %v747_v34  ;;  %1316 = vmatprep.mubr.msk.f32.mxu1 %vm1498_vm1, %v1497_v8 }
 0x1fd   : > { %1319 = vmatprep.subr.mxu1 %v1497_v8 }
 0x203   : > { %1317 = vmatmul.mubr.f32.vlgmr.msra.gmra.mrb[0].mxu1 %v734_v35 }
 0x204   : > { %1320 = vmatpush3.msra.mxu1 %v669_v28  ;;  %1321 = vmatprep.mubr.msk.f32.mxu1 %vm1498_vm1, %v1497_v8 }
 0x20b   : > { %1322 = vmatmul.mubr.f32.vlgmr.msra.gmra.mrb[0].mxu1 %v734_v35 }
 0x2de   : > { %v1110_v42 = vpop.f32.mrb[0].mxu1 }
 0x2df   : > { %v1232_v43 = vmul.f32 -1.442695, %v1110_v42  ;;  %v1323_v44 = vpop.f32.mrb[1].mxu1 }
 0x2e1   : > { %1394 = vpow2.f32 %v1232_v43 }
 0x2eb   : > { %v1395_v45 = vpop.eup %1394 }
 0x2ec   : > { %v1117_v46 = vadd.f32 1.0, %v1395_v45 }
 0x2ee   : > { %1396 = vrcp.f32 %v1117_v46 }
 0x2f8   : > { %v1397_v48 = vpop.eup %1396 }
 0x2f9   : > { %v1123_v49 = vrot.slane %v1397_v48, %v1122_v47 }
 0x2fb   : > { %1125 = vbcast.lane.b32.xlu0 %v1123_v49, 256 }
 0x36d   : > { %v1126_v54 = vpop.permute.xlu0 %1125 }
 0x36e   : > { %v1134_v55 = vrot.slane %v1126_v54, %v1133_v53 }
 0x370   : > { %v1136_v56 = vmul.f32 %v1134_v55, %v1636_v0 }
 0x372   : > { %1137 = vst [vmem:[%s186_s10] sm:$0xff] %v1136_v56 }
 0x373   : > { %1441 = shalt.err (!%p1438_p4)
}
 0x374   : > { %s1442_s29 = scalar_lea.hbm %s1695_s20, 128  ;;  %s1446_s7 = scalar_lea.hbm %s1742_s3, 256 }
 0x375   : > { %p1443_p5 = scmp.ne.s32.totalorder %s1695_s20, %s1442_s29  ;;  %p1447_p0 = scmp.lt.u32.totalorder %s1695_s20, %s1742_s3 }
 0x376   : > { %p1448_p1 = scmp.lt.u32.totalorder %s1446_s7, %s1442_s29  ;;  %p1450_p6 = scmp.lt.u32.totalorder %s1442_s29, %s1695_s20 }
 0x377   : > { %p1444_p8 = pnand %p1443_p5, %p1751_p11 }
 0x378   : > { %p1449_p3 = por %p1448_p1, %p1447_p0 }
 0x379   : > { %p1445_p9 = pneg %p1444_p8 }
 0x37a   : > { %p1451_p12 = por %p1450_p6, %p1449_p3 }
 0x37c   : > { %p1452_p13 = pnand %p1451_p12, %p1445_p9 }
 0x37e   : > { %1455 = shalt.err (!%p1452_p13)
}
 0x37f   : > { %1346 = dma.vmem_to_hbm [thread:$0]  (%p1751_p11), %s1697_s11, 128, %s1695_s20, %s1139_s22  }
 0x380 PF: > { %s1165_s23 = sand.u32 1, %s1482_s12   ;;  %p1752_p7 = scmp.ne.s32.totalorder %s1747_s25, 0 }
 0x381   : > { %p1753_p10 = scmp.ge.s32.totalorder %s1494_s15, 2  ;;  %s1166_s8 = scalar_lea.sflag [#allocation4], %s1165_s23 }
 0x383   : > { %p1353_p2 = pnand %p1753_p10, %p1752_p7 }
 0x385   : > { %1477 = dma.done.wait (!%p1353_p2), %s1166_s8, 128  }
 0x386   : > { %1479 = vsyncadd (!%p1353_p2), %s1166_s8, 4294967168  ;;  %p16_p4 = scmp.ge.s32.totalorder %s1546_s18, 4   ;;  %s1754_s12 = smov %s1486_s13 }
 0x387   : > { %s1755_s13 = smov %s1490_s14  ;;  %s1756_s14 = smov %s1558_s21 }
 0x388   : > { %s1757_s15 = smov %s1546_s18  ;;  %18 = sbr.rel (!%p16_p4) target bundleno = 5 (0x5), region = 77 }
 0x38f   :  { %1171 = vsyncpa [#allocation3], 1 }
 0x390   :  { %1173 = vsyncpa [#allocation3 + $0x1], 1 }
 0x391   :  { %1174 = vsyncpa [#allocation4], 1 }
 0x392   :  { %1176 = vsyncpa [#allocation4 + $0x1], 1 }

</bundles_post_ra>
